<compile_context>
chip_gen: v7x
topology: tpu7x:2x2x1
jax: 0.10.0
libtpu: 0.0.40
codegen_flags: <defaults>
</compile_context>

<pallas_src>
import jax
import jax.numpy as jnp
from jax import lax
from jax.experimental import pallas as pl
from jax.experimental.pallas import tpu as pltpu


def _inst_encoder_kernel(last_idx_ref, x_ref, w_ref, b_ref, out_ref):
    """Whole LSTM recurrence in one invocation.

    last_idx_ref: (B, 1)     int32  index of last nonzero token per row
    x_ref:        (T, B, E)  f32    embedded inputs, time-major
    w_ref:        (E+H, 4H)  f32    stacked [W_ih^T ; W_hh^T], gate order [i,f,g,o]
    b_ref:        (1, 4H)    f32    combined bias (b_ih + b_hh)
    out_ref:      (B, H)     f32    hidden state at last nonzero token
    """
    T, B, E = x_ref.shape
    H = out_ref.shape[-1]

    # Hoist loop-invariant operands into locals (loaded/broadcast exactly once).
    w = w_ref[...]                                      # (E+H, 4H)
    b = jnp.broadcast_to(b_ref[...], (B, 4 * H))        # (B, 4H)
    last_idx = last_idx_ref[...]                        # (B, 1)

    h0 = jnp.zeros((B, H), jnp.float32)
    c0 = jnp.zeros((B, H), jnp.float32)
    keep0 = jnp.zeros((B, H), jnp.float32)

    def step(t, carry):
        h, c, keep = carry
        x_t = x_ref[t]                                  # (B, E)
        xh = jnp.concatenate([x_t, h], axis=-1)         # (B, E+H) -> lane-dense 128
        gates = jnp.dot(xh, w, preferred_element_type=jnp.float32) + b  # (B, 4H)

        i_g = jax.nn.sigmoid(gates[:, 0 * H:1 * H])
        f_g = jax.nn.sigmoid(gates[:, 1 * H:2 * H])
        g_g = jnp.tanh(gates[:, 2 * H:3 * H])
        o_g = jax.nn.sigmoid(gates[:, 3 * H:4 * H])

        c_new = f_g * c + i_g * g_g
        h_new = o_g * jnp.tanh(c_new)

        # Keep h_new for rows whose last nonzero token index == t (register carry,
        # no per-step store to out_ref).
        keep = jnp.where(last_idx == t, h_new, keep)
        return h_new, c_new, keep

    _, _, keep = lax.fori_loop(0, T, step, (h0, c0, keep0), unroll=True)
    out_ref[...] = keep                                 # single output store


def inst_encoder_forward(inst, embed_table, w_ih_t, w_hh_t, bias):
    """inst: (B, T) int32 token ids (0 = pad).  Returns (B, H) float32."""
    B, T = inst.shape
    E = embed_table.shape[1]
    H = w_hh_t.shape[0]

    # Glue (plain XLA): embedding lookup, time-major layout, weight stacking,
    # last-nonzero index per row.
    x = jnp.take(embed_table, inst, axis=0)                     # (B, T, E)
    x = jnp.transpose(x, (1, 0, 2)).astype(jnp.float32)         # (T, B, E)
    w_stacked = jnp.concatenate([w_ih_t, w_hh_t], axis=0).astype(jnp.float32)  # (E+H, 4H)
    nz = (inst != 0).astype(jnp.int32)
    last_idx = (T - 1 - jnp.argmax(nz[:, ::-1], axis=1)).astype(jnp.int32)[:, None]  # (B,1)

    vmem = pl.BlockSpec(memory_space=pltpu.MemorySpace.VMEM)
    out = pl.pallas_call(
        _inst_encoder_kernel,
        out_shape=jax.ShapeDtypeStruct((B, H), jnp.float32),
        in_specs=[vmem, vmem, vmem, vmem],
        out_specs=vmem,
    )(last_idx, x, w_stacked, bias.astype(jnp.float32))
    return out


def _reference_forward(inst, embed_table, w_ih_t, w_hh_t, bias):
    """Pure-JAX reference (lax.scan) mirroring nn.LSTMCell semantics."""
    B, T = inst.shape
    H = w_hh_t.shape[0]
    x = jnp.take(embed_table, inst, axis=0).astype(jnp.float32)  # (B, T, E)

    def step(carry, xt):
        h, c = carry
        gates = xt @ w_ih_t + h @ w_hh_t + bias[0]
        i_g = jax.nn.sigmoid(gates[:, 0 * H:1 * H])
        f_g = jax.nn.sigmoid(gates[:, 1 * H:2 * H])
        g_g = jnp.tanh(gates[:, 2 * H:3 * H])
        o_g = jax.nn.sigmoid(gates[:, 3 * H:4 * H])
        c = f_g * c + i_g * g_g
        h = o_g * jnp.tanh(c)
        return (h, c), h

    h0 = jnp.zeros((B, H), jnp.float32)
    c0 = jnp.zeros((B, H), jnp.float32)
    _, hiddens = lax.scan(step, (h0, c0), jnp.transpose(x, (1, 0, 2)))  # (T, B, H)
    hiddens = jnp.transpose(hiddens, (1, 0, 2))                         # (B, T, H)
    nz = (inst != 0).astype(jnp.int32)
    last_idx = T - 1 - jnp.argmax(nz[:, ::-1], axis=1)
    return hiddens[jnp.arange(B), last_idx]


if __name__ == "__main__":
    B, T = 8, 8
    E = H = 64            # input_size = rnn_size = 64, as in the module
    vocab_size = 11

    key = jax.random.PRNGKey(0)
    k_emb, k_wih, k_whh, k_bih, k_bhh, k_tok, k_len = jax.random.split(key, 7)

    # Deterministic synthetic parameters (shapes from __init__).
    embed_table = jax.random.normal(k_emb, (vocab_size + 1, E), jnp.float32) * 0.1
    w_ih_t = jax.random.normal(k_wih, (E, 4 * H), jnp.float32) * 0.1   # PyTorch (4H,E)^T
    w_hh_t = jax.random.normal(k_whh, (H, 4 * H), jnp.float32) * 0.1   # PyTorch (4H,H)^T
    bias = (jax.random.normal(k_bih, (1, 4 * H), jnp.float32) * 0.1
            + jax.random.normal(k_bhh, (1, 4 * H), jnp.float32) * 0.1)

    # Synthetic instruction tokens: nonzero ids then zero padding (index 0 = pad).
    tokens = jax.random.randint(k_tok, (B, T), 1, vocab_size + 1)
    lengths = jax.random.randint(k_len, (B,), 2, T + 1)                # at least 2 tokens
    pos = jnp.arange(T)[None, :]
    inst = jnp.where(pos < lengths[:, None], tokens, 0).astype(jnp.int32)

    out = inst_encoder_forward(inst, embed_table, w_ih_t, w_hh_t, bias)
    out = jax.block_until_ready(out)

    ref = _reference_forward(inst, embed_table, w_ih_t, w_hh_t, bias)
    assert out.shape == (B, H)
    assert jnp.allclose(out, ref, atol=1e-5, rtol=1e-5), "mismatch vs reference"

    print("KERNEL_OK")
</pallas_src>

<mosaic_0001>
module attributes {stable_mosaic.version = 11 : i64} {
  func.func @_inst_encoder_kernel(%arg0: memref<8x1xi32, #tpu.memory_space<vmem>>, %arg1: memref<8x8x64xf32, #tpu.memory_space<vmem>>, %arg2: memref<128x256xf32, #tpu.memory_space<vmem>>, %arg3: memref<1x256xf32, #tpu.memory_space<vmem>>, %arg4: memref<8x64xf32, #tpu.memory_space<vmem>>) attributes {dimension_semantics = [], scalar_prefetch = 0 : i64, scratch_operands = 0 : i64, tpu.core_type = #tpu.core_type<tc>} {
    %c0 = arith.constant 0 : index
    %c0_0 = arith.constant 0 : index
    %0 = vector.load %arg2[%c0, %c0_0] : memref<128x256xf32, #tpu.memory_space<vmem>>, vector<128x256xf32>
    %c0_1 = arith.constant 0 : index
    %c0_2 = arith.constant 0 : index
    %1 = vector.load %arg3[%c0_1, %c0_2] : memref<1x256xf32, #tpu.memory_space<vmem>>, vector<1x256xf32>
    %2 = vector.shape_cast %1 : vector<1x256xf32> to vector<1x256xf32>
    %3 = vector.broadcast %2 : vector<1x256xf32> to vector<8x256xf32>
    %c0_3 = arith.constant 0 : index
    %c0_4 = arith.constant 0 : index
    %4 = vector.load %arg0[%c0_3, %c0_4] : memref<8x1xi32, #tpu.memory_space<vmem>>, vector<8x1xi32>
    %cst = arith.constant 0.000000e+00 : f32
    %5 = vector.broadcast %cst : f32 to vector<8x64xf32>
    %cst_5 = arith.constant 0.000000e+00 : f32
    %6 = vector.broadcast %cst_5 : f32 to vector<8x64xf32>
    %cst_6 = arith.constant 0.000000e+00 : f32
    %7 = vector.broadcast %cst_6 : f32 to vector<8x64xf32>
    %c0_i32 = arith.constant 0 : i32
    %8 = arith.index_cast %c0_i32 : i32 to index
    %c0_7 = arith.constant 0 : index
    %c0_8 = arith.constant 0 : index
    %9 = vector.load %arg1[%8, %c0_7, %c0_8] : memref<8x8x64xf32, #tpu.memory_space<vmem>>, vector<1x8x64xf32>
    %10 = vector.shape_cast %9 : vector<1x8x64xf32> to vector<8x64xf32>
    %11 = tpu.concatenate %10, %5 in 1 : vector<8x64xf32>, vector<8x64xf32> -> vector<8x128xf32>
    %cst_9 = arith.constant dense<0.000000e+00> : vector<8x256xf32>
    %12 = tpu.matmul %11, %0, %cst_9 {dimension_numbers = #tpu.dot_dimension_numbers<[1], [0], [0], [1], [0, 0, 1, 1], [], []>} : vector<8x128xf32>, vector<128x256xf32>, vector<8x256xf32> -> vector<8x256xf32>
    %13 = arith.addf %12, %3 : vector<8x256xf32>
    %14 = vector.extract_strided_slice %13 {offsets = [0, 0], sizes = [8, 64], strides = [1, 1]} : vector<8x256xf32> to vector<8x64xf32>
    %15 = arith.negf %14 : vector<8x64xf32>
    %16 = math.exp %15 : vector<8x64xf32>
    %cst_10 = arith.constant 1.000000e+00 : f32
    %17 = vector.broadcast %cst_10 : f32 to vector<8x64xf32>
    %18 = arith.addf %17, %16 : vector<8x64xf32>
    %19 = arith.divf %17, %18 : vector<8x64xf32>
    %20 = vector.extract_strided_slice %13 {offsets = [0, 64], sizes = [8, 64], strides = [1, 1]} : vector<8x256xf32> to vector<8x64xf32>
    %21 = arith.negf %20 : vector<8x64xf32>
    %22 = math.exp %21 : vector<8x64xf32>
    %cst_11 = arith.constant 1.000000e+00 : f32
    %23 = vector.broadcast %cst_11 : f32 to vector<8x64xf32>
    %24 = arith.addf %23, %22 : vector<8x64xf32>
    %25 = arith.divf %23, %24 : vector<8x64xf32>
    %26 = vector.extract_strided_slice %13 {offsets = [0, 128], sizes = [8, 64], strides = [1, 1]} : vector<8x256xf32> to vector<8x64xf32>
    %27 = math.tanh %26 : vector<8x64xf32>
    %28 = vector.extract_strided_slice %13 {offsets = [0, 192], sizes = [8, 64], strides = [1, 1]} : vector<8x256xf32> to vector<8x64xf32>
    %29 = arith.negf %28 : vector<8x64xf32>
    %30 = math.exp %29 : vector<8x64xf32>
    %cst_12 = arith.constant 1.000000e+00 : f32
    %31 = vector.broadcast %cst_12 : f32 to vector<8x64xf32>
    %32 = arith.addf %31, %30 : vector<8x64xf32>
    %33 = arith.divf %31, %32 : vector<8x64xf32>
    %34 = arith.mulf %25, %6 : vector<8x64xf32>
    %35 = arith.mulf %19, %27 : vector<8x64xf32>
    %36 = arith.addf %34, %35 : vector<8x64xf32>
    %37 = math.tanh %36 : vector<8x64xf32>
    %38 = arith.mulf %33, %37 : vector<8x64xf32>
    %39 = vector.broadcast %c0_i32 : i32 to vector<8x1xi32>
    %40 = arith.cmpi eq, %4, %39 : vector<8x1xi32>
    %41 = vector.shape_cast %40 : vector<8x1xi1> to vector<8x1xi1>
    %42 = vector.broadcast %41 : vector<8x1xi1> to vector<8x64xi1>
    %43 = arith.select %42, %38, %7 : vector<8x64xi1>, vector<8x64xf32>
    %c1_i32 = arith.constant 1 : i32
    %44 = arith.index_cast %c1_i32 : i32 to index
    %c0_13 = arith.constant 0 : index
    %c0_14 = arith.constant 0 : index
    %45 = vector.load %arg1[%44, %c0_13, %c0_14] : memref<8x8x64xf32, #tpu.memory_space<vmem>>, vector<1x8x64xf32>
    %46 = vector.shape_cast %45 : vector<1x8x64xf32> to vector<8x64xf32>
    %47 = tpu.concatenate %46, %38 in 1 : vector<8x64xf32>, vector<8x64xf32> -> vector<8x128xf32>
    %cst_15 = arith.constant dense<0.000000e+00> : vector<8x256xf32>
    %48 = tpu.matmul %47, %0, %cst_15 {dimension_numbers = #tpu.dot_dimension_numbers<[1], [0], [0], [1], [0, 0, 1, 1], [], []>} : vector<8x128xf32>, vector<128x256xf32>, vector<8x256xf32> -> vector<8x256xf32>
    %49 = arith.addf %48, %3 : vector<8x256xf32>
    %50 = vector.extract_strided_slice %49 {offsets = [0, 0], sizes = [8, 64], strides = [1, 1]} : vector<8x256xf32> to vector<8x64xf32>
    %51 = arith.negf %50 : vector<8x64xf32>
    %52 = math.exp %51 : vector<8x64xf32>
    %cst_16 = arith.constant 1.000000e+00 : f32
    %53 = vector.broadcast %cst_16 : f32 to vector<8x64xf32>
    %54 = arith.addf %53, %52 : vector<8x64xf32>
    %55 = arith.divf %53, %54 : vector<8x64xf32>
    %56 = vector.extract_strided_slice %49 {offsets = [0, 64], sizes = [8, 64], strides = [1, 1]} : vector<8x256xf32> to vector<8x64xf32>
    %57 = arith.negf %56 : vector<8x64xf32>
    %58 = math.exp %57 : vector<8x64xf32>
    %cst_17 = arith.constant 1.000000e+00 : f32
    %59 = vector.broadcast %cst_17 : f32 to vector<8x64xf32>
    %60 = arith.addf %59, %58 : vector<8x64xf32>
    %61 = arith.divf %59, %60 : vector<8x64xf32>
    %62 = vector.extract_strided_slice %49 {offsets = [0, 128], sizes = [8, 64], strides = [1, 1]} : vector<8x256xf32> to vector<8x64xf32>
    %63 = math.tanh %62 : vector<8x64xf32>
    %64 = vector.extract_strided_slice %49 {offsets = [0, 192], sizes = [8, 64], strides = [1, 1]} : vector<8x256xf32> to vector<8x64xf32>
    %65 = arith.negf %64 : vector<8x64xf32>
    %66 = math.exp %65 : vector<8x64xf32>
    %cst_18 = arith.constant 1.000000e+00 : f32
    %67 = vector.broadcast %cst_18 : f32 to vector<8x64xf32>
    %68 = arith.addf %67, %66 : vector<8x64xf32>
    %69 = arith.divf %67, %68 : vector<8x64xf32>
    %70 = arith.mulf %61, %36 : vector<8x64xf32>
    %71 = arith.mulf %55, %63 : vector<8x64xf32>
    %72 = arith.addf %70, %71 : vector<8x64xf32>
    %73 = math.tanh %72 : vector<8x64xf32>
    %74 = arith.mulf %69, %73 : vector<8x64xf32>
    %75 = vector.broadcast %c1_i32 : i32 to vector<8x1xi32>
    %76 = arith.cmpi eq, %4, %75 : vector<8x1xi32>
    %77 = vector.shape_cast %76 : vector<8x1xi1> to vector<8x1xi1>
    %78 = vector.broadcast %77 : vector<8x1xi1> to vector<8x64xi1>
    %79 = arith.select %78, %74, %43 : vector<8x64xi1>, vector<8x64xf32>
    %c2_i32 = arith.constant 2 : i32
    %80 = arith.index_cast %c2_i32 : i32 to index
    %c0_19 = arith.constant 0 : index
    %c0_20 = arith.constant 0 : index
    %81 = vector.load %arg1[%80, %c0_19, %c0_20] : memref<8x8x64xf32, #tpu.memory_space<vmem>>, vector<1x8x64xf32>
    %82 = vector.shape_cast %81 : vector<1x8x64xf32> to vector<8x64xf32>
    %83 = tpu.concatenate %82, %74 in 1 : vector<8x64xf32>, vector<8x64xf32> -> vector<8x128xf32>
    %cst_21 = arith.constant dense<0.000000e+00> : vector<8x256xf32>
    %84 = tpu.matmul %83, %0, %cst_21 {dimension_numbers = #tpu.dot_dimension_numbers<[1], [0], [0], [1], [0, 0, 1, 1], [], []>} : vector<8x128xf32>, vector<128x256xf32>, vector<8x256xf32> -> vector<8x256xf32>
    %85 = arith.addf %84, %3 : vector<8x256xf32>
    %86 = vector.extract_strided_slice %85 {offsets = [0, 0], sizes = [8, 64], strides = [1, 1]} : vector<8x256xf32> to vector<8x64xf32>
    %87 = arith.negf %86 : vector<8x64xf32>
    %88 = math.exp %87 : vector<8x64xf32>
    %cst_22 = arith.constant 1.000000e+00 : f32
    %89 = vector.broadcast %cst_22 : f32 to vector<8x64xf32>
    %90 = arith.addf %89, %88 : vector<8x64xf32>
    %91 = arith.divf %89, %90 : vector<8x64xf32>
    %92 = vector.extract_strided_slice %85 {offsets = [0, 64], sizes = [8, 64], strides = [1, 1]} : vector<8x256xf32> to vector<8x64xf32>
    %93 = arith.negf %92 : vector<8x64xf32>
    %94 = math.exp %93 : vector<8x64xf32>
    %cst_23 = arith.constant 1.000000e+00 : f32
    %95 = vector.broadcast %cst_23 : f32 to vector<8x64xf32>
    %96 = arith.addf %95, %94 : vector<8x64xf32>
    %97 = arith.divf %95, %96 : vector<8x64xf32>
    %98 = vector.extract_strided_slice %85 {offsets = [0, 128], sizes = [8, 64], strides = [1, 1]} : vector<8x256xf32> to vector<8x64xf32>
    %99 = math.tanh %98 : vector<8x64xf32>
    %100 = vector.extract_strided_slice %85 {offsets = [0, 192], sizes = [8, 64], strides = [1, 1]} : vector<8x256xf32> to vector<8x64xf32>
    %101 = arith.negf %100 : vector<8x64xf32>
    %102 = math.exp %101 : vector<8x64xf32>
    %cst_24 = arith.constant 1.000000e+00 : f32
    %103 = vector.broadcast %cst_24 : f32 to vector<8x64xf32>
    %104 = arith.addf %103, %102 : vector<8x64xf32>
    %105 = arith.divf %103, %104 : vector<8x64xf32>
    %106 = arith.mulf %97, %72 : vector<8x64xf32>
    %107 = arith.mulf %91, %99 : vector<8x64xf32>
    %108 = arith.addf %106, %107 : vector<8x64xf32>
    %109 = math.tanh %108 : vector<8x64xf32>
    %110 = arith.mulf %105, %109 : vector<8x64xf32>
    %111 = vector.broadcast %c2_i32 : i32 to vector<8x1xi32>
    %112 = arith.cmpi eq, %4, %111 : vector<8x1xi32>
    %113 = vector.shape_cast %112 : vector<8x1xi1> to vector<8x1xi1>
    %114 = vector.broadcast %113 : vector<8x1xi1> to vector<8x64xi1>
    %115 = arith.select %114, %110, %79 : vector<8x64xi1>, vector<8x64xf32>
    %c3_i32 = arith.constant 3 : i32
    %116 = arith.index_cast %c3_i32 : i32 to index
    %c0_25 = arith.constant 0 : index
    %c0_26 = arith.constant 0 : index
    %117 = vector.load %arg1[%116, %c0_25, %c0_26] : memref<8x8x64xf32, #tpu.memory_space<vmem>>, vector<1x8x64xf32>
    %118 = vector.shape_cast %117 : vector<1x8x64xf32> to vector<8x64xf32>
    %119 = tpu.concatenate %118, %110 in 1 : vector<8x64xf32>, vector<8x64xf32> -> vector<8x128xf32>
    %cst_27 = arith.constant dense<0.000000e+00> : vector<8x256xf32>
    %120 = tpu.matmul %119, %0, %cst_27 {dimension_numbers = #tpu.dot_dimension_numbers<[1], [0], [0], [1], [0, 0, 1, 1], [], []>} : vector<8x128xf32>, vector<128x256xf32>, vector<8x256xf32> -> vector<8x256xf32>
    %121 = arith.addf %120, %3 : vector<8x256xf32>
    %122 = vector.extract_strided_slice %121 {offsets = [0, 0], sizes = [8, 64], strides = [1, 1]} : vector<8x256xf32> to vector<8x64xf32>
    %123 = arith.negf %122 : vector<8x64xf32>
    %124 = math.exp %123 : vector<8x64xf32>
    %cst_28 = arith.constant 1.000000e+00 : f32
    %125 = vector.broadcast %cst_28 : f32 to vector<8x64xf32>
    %126 = arith.addf %125, %124 : vector<8x64xf32>
    %127 = arith.divf %125, %126 : vector<8x64xf32>
    %128 = vector.extract_strided_slice %121 {offsets = [0, 64], sizes = [8, 64], strides = [1, 1]} : vector<8x256xf32> to vector<8x64xf32>
    %129 = arith.negf %128 : vector<8x64xf32>
    %130 = math.exp %129 : vector<8x64xf32>
    %cst_29 = arith.constant 1.000000e+00 : f32
    %131 = vector.broadcast %cst_29 : f32 to vector<8x64xf32>
    %132 = arith.addf %131, %130 : vector<8x64xf32>
    %133 = arith.divf %131, %132 : vector<8x64xf32>
    %134 = vector.extract_strided_slice %121 {offsets = [0, 128], sizes = [8, 64], strides = [1, 1]} : vector<8x256xf32> to vector<8x64xf32>
    %135 = math.tanh %134 : vector<8x64xf32>
    %136 = vector.extract_strided_slice %121 {offsets = [0, 192], sizes = [8, 64], strides = [1, 1]} : vector<8x256xf32> to vector<8x64xf32>
    %137 = arith.negf %136 : vector<8x64xf32>
    %138 = math.exp %137 : vector<8x64xf32>
    %cst_30 = arith.constant 1.000000e+00 : f32
    %139 = vector.broadcast %cst_30 : f32 to vector<8x64xf32>
    %140 = arith.addf %139, %138 : vector<8x64xf32>
    %141 = arith.divf %139, %140 : vector<8x64xf32>
    %142 = arith.mulf %133, %108 : vector<8x64xf32>
    %143 = arith.mulf %127, %135 : vector<8x64xf32>
    %144 = arith.addf %142, %143 : vector<8x64xf32>
    %145 = math.tanh %144 : vector<8x64xf32>
    %146 = arith.mulf %141, %145 : vector<8x64xf32>
    %147 = vector.broadcast %c3_i32 : i32 to vector<8x1xi32>
    %148 = arith.cmpi eq, %4, %147 : vector<8x1xi32>
    %149 = vector.shape_cast %148 : vector<8x1xi1> to vector<8x1xi1>
    %150 = vector.broadcast %149 : vector<8x1xi1> to vector<8x64xi1>
    %151 = arith.select %150, %146, %115 : vector<8x64xi1>, vector<8x64xf32>
    %c4_i32 = arith.constant 4 : i32
    %152 = arith.index_cast %c4_i32 : i32 to index
    %c0_31 = arith.constant 0 : index
    %c0_32 = arith.constant 0 : index
    %153 = vector.load %arg1[%152, %c0_31, %c0_32] : memref<8x8x64xf32, #tpu.memory_space<vmem>>, vector<1x8x64xf32>
    %154 = vector.shape_cast %153 : vector<1x8x64xf32> to vector<8x64xf32>
    %155 = tpu.concatenate %154, %146 in 1 : vector<8x64xf32>, vector<8x64xf32> -> vector<8x128xf32>
    %cst_33 = arith.constant dense<0.000000e+00> : vector<8x256xf32>
    %156 = tpu.matmul %155, %0, %cst_33 {dimension_numbers = #tpu.dot_dimension_numbers<[1], [0], [0], [1], [0, 0, 1, 1], [], []>} : vector<8x128xf32>, vector<128x256xf32>, vector<8x256xf32> -> vector<8x256xf32>
    %157 = arith.addf %156, %3 : vector<8x256xf32>
    %158 = vector.extract_strided_slice %157 {offsets = [0, 0], sizes = [8, 64], strides = [1, 1]} : vector<8x256xf32> to vector<8x64xf32>
    %159 = arith.negf %158 : vector<8x64xf32>
    %160 = math.exp %159 : vector<8x64xf32>
    %cst_34 = arith.constant 1.000000e+00 : f32
    %161 = vector.broadcast %cst_34 : f32 to vector<8x64xf32>
    %162 = arith.addf %161, %160 : vector<8x64xf32>
    %163 = arith.divf %161, %162 : vector<8x64xf32>
    %164 = vector.extract_strided_slice %157 {offsets = [0, 64], sizes = [8, 64], strides = [1, 1]} : vector<8x256xf32> to vector<8x64xf32>
    %165 = arith.negf %164 : vector<8x64xf32>
    %166 = math.exp %165 : vector<8x64xf32>
    %cst_35 = arith.constant 1.000000e+00 : f32
    %167 = vector.broadcast %cst_35 : f32 to vector<8x64xf32>
    %168 = arith.addf %167, %166 : vector<8x64xf32>
    %169 = arith.divf %167, %168 : vector<8x64xf32>
    %170 = vector.extract_strided_slice %157 {offsets = [0, 128], sizes = [8, 64], strides = [1, 1]} : vector<8x256xf32> to vector<8x64xf32>
    %171 = math.tanh %170 : vector<8x64xf32>
    %172 = vector.extract_strided_slice %157 {offsets = [0, 192], sizes = [8, 64], strides = [1, 1]} : vector<8x256xf32> to vector<8x64xf32>
    %173 = arith.negf %172 : vector<8x64xf32>
    %174 = math.exp %173 : vector<8x64xf32>
    %cst_36 = arith.constant 1.000000e+00 : f32
    %175 = vector.broadcast %cst_36 : f32 to vector<8x64xf32>
    %176 = arith.addf %175, %174 : vector<8x64xf32>
    %177 = arith.divf %175, %176 : vector<8x64xf32>
    %178 = arith.mulf %169, %144 : vector<8x64xf32>
    %179 = arith.mulf %163, %171 : vector<8x64xf32>
    %180 = arith.addf %178, %179 : vector<8x64xf32>
    %181 = math.tanh %180 : vector<8x64xf32>
    %182 = arith.mulf %177, %181 : vector<8x64xf32>
    %183 = vector.broadcast %c4_i32 : i32 to vector<8x1xi32>
    %184 = arith.cmpi eq, %4, %183 : vector<8x1xi32>
    %185 = vector.shape_cast %184 : vector<8x1xi1> to vector<8x1xi1>
    %186 = vector.broadcast %185 : vector<8x1xi1> to vector<8x64xi1>
    %187 = arith.select %186, %182, %151 : vector<8x64xi1>, vector<8x64xf32>
    %c5_i32 = arith.constant 5 : i32
    %188 = arith.index_cast %c5_i32 : i32 to index
    %c0_37 = arith.constant 0 : index
    %c0_38 = arith.constant 0 : index
    %189 = vector.load %arg1[%188, %c0_37, %c0_38] : memref<8x8x64xf32, #tpu.memory_space<vmem>>, vector<1x8x64xf32>
    %190 = vector.shape_cast %189 : vector<1x8x64xf32> to vector<8x64xf32>
    %191 = tpu.concatenate %190, %182 in 1 : vector<8x64xf32>, vector<8x64xf32> -> vector<8x128xf32>
    %cst_39 = arith.constant dense<0.000000e+00> : vector<8x256xf32>
    %192 = tpu.matmul %191, %0, %cst_39 {dimension_numbers = #tpu.dot_dimension_numbers<[1], [0], [0], [1], [0, 0, 1, 1], [], []>} : vector<8x128xf32>, vector<128x256xf32>, vector<8x256xf32> -> vector<8x256xf32>
    %193 = arith.addf %192, %3 : vector<8x256xf32>
    %194 = vector.extract_strided_slice %193 {offsets = [0, 0], sizes = [8, 64], strides = [1, 1]} : vector<8x256xf32> to vector<8x64xf32>
    %195 = arith.negf %194 : vector<8x64xf32>
    %196 = math.exp %195 : vector<8x64xf32>
    %cst_40 = arith.constant 1.000000e+00 : f32
    %197 = vector.broadcast %cst_40 : f32 to vector<8x64xf32>
    %198 = arith.addf %197, %196 : vector<8x64xf32>
    %199 = arith.divf %197, %198 : vector<8x64xf32>
    %200 = vector.extract_strided_slice %193 {offsets = [0, 64], sizes = [8, 64], strides = [1, 1]} : vector<8x256xf32> to vector<8x64xf32>
    %201 = arith.negf %200 : vector<8x64xf32>
    %202 = math.exp %201 : vector<8x64xf32>
    %cst_41 = arith.constant 1.000000e+00 : f32
    %203 = vector.broadcast %cst_41 : f32 to vector<8x64xf32>
    %204 = arith.addf %203, %202 : vector<8x64xf32>
    %205 = arith.divf %203, %204 : vector<8x64xf32>
    %206 = vector.extract_strided_slice %193 {offsets = [0, 128], sizes = [8, 64], strides = [1, 1]} : vector<8x256xf32> to vector<8x64xf32>
    %207 = math.tanh %206 : vector<8x64xf32>
    %208 = vector.extract_strided_slice %193 {offsets = [0, 192], sizes = [8, 64], strides = [1, 1]} : vector<8x256xf32> to vector<8x64xf32>
    %209 = arith.negf %208 : vector<8x64xf32>
    %210 = math.exp %209 : vector<8x64xf32>
    %cst_42 = arith.constant 1.000000e+00 : f32
    %211 = vector.broadcast %cst_42 : f32 to vector<8x64xf32>
    %212 = arith.addf %211, %210 : vector<8x64xf32>
    %213 = arith.divf %211, %212 : vector<8x64xf32>
    %214 = arith.mulf %205, %180 : vector<8x64xf32>
    %215 = arith.mulf %199, %207 : vector<8x64xf32>
    %216 = arith.addf %214, %215 : vector<8x64xf32>
    %217 = math.tanh %216 : vector<8x64xf32>
    %218 = arith.mulf %213, %217 : vector<8x64xf32>
    %219 = vector.broadcast %c5_i32 : i32 to vector<8x1xi32>
    %220 = arith.cmpi eq, %4, %219 : vector<8x1xi32>
    %221 = vector.shape_cast %220 : vector<8x1xi1> to vector<8x1xi1>
    %222 = vector.broadcast %221 : vector<8x1xi1> to vector<8x64xi1>
    %223 = arith.select %222, %218, %187 : vector<8x64xi1>, vector<8x64xf32>
    %c6_i32 = arith.constant 6 : i32
    %224 = arith.index_cast %c6_i32 : i32 to index
    %c0_43 = arith.constant 0 : index
    %c0_44 = arith.constant 0 : index
    %225 = vector.load %arg1[%224, %c0_43, %c0_44] : memref<8x8x64xf32, #tpu.memory_space<vmem>>, vector<1x8x64xf32>
    %226 = vector.shape_cast %225 : vector<1x8x64xf32> to vector<8x64xf32>
    %227 = tpu.concatenate %226, %218 in 1 : vector<8x64xf32>, vector<8x64xf32> -> vector<8x128xf32>
    %cst_45 = arith.constant dense<0.000000e+00> : vector<8x256xf32>
    %228 = tpu.matmul %227, %0, %cst_45 {dimension_numbers = #tpu.dot_dimension_numbers<[1], [0], [0], [1], [0, 0, 1, 1], [], []>} : vector<8x128xf32>, vector<128x256xf32>, vector<8x256xf32> -> vector<8x256xf32>
    %229 = arith.addf %228, %3 : vector<8x256xf32>
    %230 = vector.extract_strided_slice %229 {offsets = [0, 0], sizes = [8, 64], strides = [1, 1]} : vector<8x256xf32> to vector<8x64xf32>
    %231 = arith.negf %230 : vector<8x64xf32>
    %232 = math.exp %231 : vector<8x64xf32>
    %cst_46 = arith.constant 1.000000e+00 : f32
    %233 = vector.broadcast %cst_46 : f32 to vector<8x64xf32>
    %234 = arith.addf %233, %232 : vector<8x64xf32>
    %235 = arith.divf %233, %234 : vector<8x64xf32>
    %236 = vector.extract_strided_slice %229 {offsets = [0, 64], sizes = [8, 64], strides = [1, 1]} : vector<8x256xf32> to vector<8x64xf32>
    %237 = arith.negf %236 : vector<8x64xf32>
    %238 = math.exp %237 : vector<8x64xf32>
    %cst_47 = arith.constant 1.000000e+00 : f32
    %239 = vector.broadcast %cst_47 : f32 to vector<8x64xf32>
    %240 = arith.addf %239, %238 : vector<8x64xf32>
    %241 = arith.divf %239, %240 : vector<8x64xf32>
    %242 = vector.extract_strided_slice %229 {offsets = [0, 128], sizes = [8, 64], strides = [1, 1]} : vector<8x256xf32> to vector<8x64xf32>
    %243 = math.tanh %242 : vector<8x64xf32>
    %244 = vector.extract_strided_slice %229 {offsets = [0, 192], sizes = [8, 64], strides = [1, 1]} : vector<8x256xf32> to vector<8x64xf32>
    %245 = arith.negf %244 : vector<8x64xf32>
    %246 = math.exp %245 : vector<8x64xf32>
    %cst_48 = arith.constant 1.000000e+00 : f32
    %247 = vector.broadcast %cst_48 : f32 to vector<8x64xf32>
    %248 = arith.addf %247, %246 : vector<8x64xf32>
    %249 = arith.divf %247, %248 : vector<8x64xf32>
    %250 = arith.mulf %241, %216 : vector<8x64xf32>
    %251 = arith.mulf %235, %243 : vector<8x64xf32>
    %252 = arith.addf %250, %251 : vector<8x64xf32>
    %253 = math.tanh %252 : vector<8x64xf32>
    %254 = arith.mulf %249, %253 : vector<8x64xf32>
    %255 = vector.broadcast %c6_i32 : i32 to vector<8x1xi32>
    %256 = arith.cmpi eq, %4, %255 : vector<8x1xi32>
    %257 = vector.shape_cast %256 : vector<8x1xi1> to vector<8x1xi1>
    %258 = vector.broadcast %257 : vector<8x1xi1> to vector<8x64xi1>
    %259 = arith.select %258, %254, %223 : vector<8x64xi1>, vector<8x64xf32>
    %c7_i32 = arith.constant 7 : i32
    %260 = arith.index_cast %c7_i32 : i32 to index
    %c0_49 = arith.constant 0 : index
    %c0_50 = arith.constant 0 : index
    %261 = vector.load %arg1[%260, %c0_49, %c0_50] : memref<8x8x64xf32, #tpu.memory_space<vmem>>, vector<1x8x64xf32>
    %262 = vector.shape_cast %261 : vector<1x8x64xf32> to vector<8x64xf32>
    %263 = tpu.concatenate %262, %254 in 1 : vector<8x64xf32>, vector<8x64xf32> -> vector<8x128xf32>
    %cst_51 = arith.constant dense<0.000000e+00> : vector<8x256xf32>
    %264 = tpu.matmul %263, %0, %cst_51 {dimension_numbers = #tpu.dot_dimension_numbers<[1], [0], [0], [1], [0, 0, 1, 1], [], []>} : vector<8x128xf32>, vector<128x256xf32>, vector<8x256xf32> -> vector<8x256xf32>
    %265 = arith.addf %264, %3 : vector<8x256xf32>
    %266 = vector.extract_strided_slice %265 {offsets = [0, 0], sizes = [8, 64], strides = [1, 1]} : vector<8x256xf32> to vector<8x64xf32>
    %267 = arith.negf %266 : vector<8x64xf32>
    %268 = math.exp %267 : vector<8x64xf32>
    %cst_52 = arith.constant 1.000000e+00 : f32
    %269 = vector.broadcast %cst_52 : f32 to vector<8x64xf32>
    %270 = arith.addf %269, %268 : vector<8x64xf32>
    %271 = arith.divf %269, %270 : vector<8x64xf32>
    %272 = vector.extract_strided_slice %265 {offsets = [0, 64], sizes = [8, 64], strides = [1, 1]} : vector<8x256xf32> to vector<8x64xf32>
    %273 = arith.negf %272 : vector<8x64xf32>
    %274 = math.exp %273 : vector<8x64xf32>
    %cst_53 = arith.constant 1.000000e+00 : f32
    %275 = vector.broadcast %cst_53 : f32 to vector<8x64xf32>
    %276 = arith.addf %275, %274 : vector<8x64xf32>
    %277 = arith.divf %275, %276 : vector<8x64xf32>
    %278 = vector.extract_strided_slice %265 {offsets = [0, 128], sizes = [8, 64], strides = [1, 1]} : vector<8x256xf32> to vector<8x64xf32>
    %279 = math.tanh %278 : vector<8x64xf32>
    %280 = vector.extract_strided_slice %265 {offsets = [0, 192], sizes = [8, 64], strides = [1, 1]} : vector<8x256xf32> to vector<8x64xf32>
    %281 = arith.negf %280 : vector<8x64xf32>
    %282 = math.exp %281 : vector<8x64xf32>
    %cst_54 = arith.constant 1.000000e+00 : f32
    %283 = vector.broadcast %cst_54 : f32 to vector<8x64xf32>
    %284 = arith.addf %283, %282 : vector<8x64xf32>
    %285 = arith.divf %283, %284 : vector<8x64xf32>
    %286 = arith.mulf %277, %252 : vector<8x64xf32>
    %287 = arith.mulf %271, %279 : vector<8x64xf32>
    %288 = arith.addf %286, %287 : vector<8x64xf32>
    %289 = math.tanh %288 : vector<8x64xf32>
    %290 = arith.mulf %285, %289 : vector<8x64xf32>
    %291 = vector.broadcast %c7_i32 : i32 to vector<8x1xi32>
    %292 = arith.cmpi eq, %4, %291 : vector<8x1xi32>
    %293 = vector.shape_cast %292 : vector<8x1xi1> to vector<8x1xi1>
    %294 = vector.broadcast %293 : vector<8x1xi1> to vector<8x64xi1>
    %295 = arith.select %294, %290, %259 : vector<8x64xi1>, vector<8x64xf32>
    %c8_i32 = arith.constant 8 : i32
    %c0_55 = arith.constant 0 : index
    %c0_56 = arith.constant 0 : index
    %296 = vector.load %arg4[%c0_55, %c0_56] : memref<8x64xf32, #tpu.memory_space<vmem>>, vector<8x64xf32>
    tpu.vector_store %arg4[%c0_55, %c0_56], %295 {strides = array<i32>} : memref<8x64xf32, #tpu.memory_space<vmem>>, vector<8x64xf32>,
    return
  }
}

</mosaic_0001>

<bundles_post_ra>
// kernel: tpu_custom_call.1
= control target key start
LH: loop header
LB: loop body
LE: loop exit
PB: predicated region body
PF: predicated region fallthrough
CT: control target
= control target key end

     0   :  { %9 = vsyncpa [#allocation3], 0  ;;  %s1716_s0 = inlined_call_operand.vmem [shape: s32[8,1], index: 0, kind: input, shape index: {}]   ;;  %s1717_s1 = inlined_call_operand.hbm [shape: f32[8,8,64], index: 1, kind: input, shape index: {}]   ;;  %s1718_s2 = inlined_call_operand.hbm [shape: f32[128,256], index: 2, kind: input, shape index: {}]   ;;  %s1719_s3 = inlined_call_operand.vmem [shape: f32[1,256], index: 3, kind: input, shape index: {}]   ;;  %s1720_s4 = inlined_call_operand.hbm [shape: f32[8,64], index: 4, kind: output, shape index: {}]  }
   0x1   :  { %10 = vsyncpa [#allocation6], 0 }
   0x2   :  { %11 = vsyncpa [#allocation4], 0  ;;  %s1389_s15 = smov [#allocation2]   ;;  %s1317_s19 = scalar_lea.hbm %s1717_s1, 1024 }
   0x3   :  { %s19_s16 = sshll.u32 %s1389_s15, 4  ;;  %p1318_p0 = scmp.ne.s32.totalorder %s1717_s1, %s1317_s19  ;;  %s20_s16 = int_to_ptr.vmem [resolvable:$true] %s19_s16 }
   0x4   :  { %p1321_p1 = scmp.lt.u32.totalorder %s1317_s19, %s1717_s1 }
   0x6   :  { %p1323_p2 = pnand %p1321_p1, %p1318_p0 }
   0x8   :  { %1326 = shalt.err (!%p1323_p2)
}
   0x9   :  { %s1327_s24 = scalar_lea.vmem %s20_s16, 1024  ;;  %p1332_p4 = scmp.lt.s32.totalorder %s20_s16, %s20_s16 }
   0xa   :  { %p1328_p3 = scmp.ne.s32.totalorder %s20_s16, %s1327_s24  ;;  %p1333_p5 = scmp.lt.s32.totalorder %s1327_s24, %s1327_s24 }
   0xc   :  { %p1334_p6 = por %p1333_p5, %p1332_p4 }
   0xe   :  { %p1335_p7 = pnand %p1334_p6, %p1328_p3 }
  0x10   :  { %1338 = shalt.err (!%p1335_p7)
}
  0x11   :  { %s1390_s25 = smov 128   ;;  %s1391_s26 = smov 8  }
  0x12   :  { %25 = dma.hbm_to_vmem [thread:$0]  %s1717_s1, 1024, %s20_s16, [#allocation3], %s1390_s25, %s1390_s25, %s1391_s26  }
  0x13   :  { %s1392_s29 = smov [#allocation5]   ;;  %s1339_s7 = scalar_lea.hbm %s1718_s2, 4096 }
  0x14   :  { %s31_s30 = sshll.u32 %s1392_s29, 4  ;;  %p1340_p8 = scmp.ne.s32.totalorder %s1718_s2, %s1339_s7  ;;  %s32_s30 = int_to_ptr.vmem [resolvable:$true] %s31_s30 }
  0x15   :  { %p1343_p9 = scmp.lt.u32.totalorder %s1339_s7, %s1718_s2 }
  0x17   :  { %p1345_p10 = pnand %p1343_p9, %p1340_p8 }
  0x19   :  { %1348 = shalt.err (!%p1345_p10)
}
  0x1a   :  { %s1349_s12 = scalar_lea.vmem %s32_s30, 4096  ;;  %p1354_p12 = scmp.lt.s32.totalorder %s32_s30, %s32_s30 }
  0x1b   :  { %p1350_p11 = scmp.ne.s32.totalorder %s32_s30, %s1349_s12  ;;  %p1355_p13 = scmp.lt.s32.totalorder %s1349_s12, %s1349_s12 }
  0x1d   :  { %p1356_p0 = por %p1355_p13, %p1354_p12 }
  0x1f   :  { %p1357_p1 = pnand %p1356_p0, %p1350_p11 }
  0x21   :  { %1360 = shalt.err (!%p1357_p1)
}
  0x22   :  { %s1393_s1 = smov 256   ;;  %s1394_s13 = smov 16  }
  0x23   :  { %37 = dma.hbm_to_vmem [thread:$0]  %s1718_s2, 4096, %s32_s30, [#allocation6], %s1393_s1, %s1393_s1, %s1394_s13  }
  0x24   :  { %1383 = dma.done.wait [#allocation3], 1024  }
  0x25   :  { %1384 = vsyncadd [#allocation3], 4294966272 }
  0x26   :  { %1385 = dma.done.wait [#allocation6], 4096  }
  0x27   :  { %1386 = vsyncadd [#allocation6], 4294963200  ;;  %v1395_v0 = vmov 0.0   ;;  %v47_v1 = vld [vmem:[#allocation5 + $0x8] sm:$0xff]  ;;  %v49_v2 = vld [vmem:[#allocation5 + $0x18] sm:$0xff]  ;;  %vm92_vm0 = vcmask 523264   ;;  %v80_v50 = vlaneseq }
  0x28   :  { %158 = vmatprep.mubr.f32.mxu0 %v1395_v0  ;;  %261 = vmatprep.mubr.f32.mxu1 %v1395_v0  ;;  %v46_v3 = vld [vmem:[#allocation5] sm:$0xff]  ;;  %v1450_v4 = vpack.c.bf16 %v49_v2, %v47_v1  ;;  %v48_v5 = vld [vmem:[#allocation5 + $0x10] sm:$0xff]  ;;  %v51_v6 = vld [vmem:[#allocation5 + $0x28] sm:$0xff] }
  0x29   :  { %v53_v7 = vld [vmem:[#allocation5 + $0x38] sm:$0xff]  ;;  %v1452_v8 = vpack.c.bf16 %v48_v5, %v46_v3  ;;  %v50_v10 = vld [vmem:[#allocation5 + $0x20] sm:$0xff]  ;;  %v52_v11 = vld [vmem:[#allocation5 + $0x30] sm:$0xff]  ;;  %v81_v51 = vshrl.u32 %v80_v50, 7 }
  0x2a   :  { %v1454_v9 = vpack.c.bf16 %v53_v7, %v51_v6  ;;  %v55_v12 = vld [vmem:[#allocation5 + $0x48] sm:$0xff]  ;;  %954 = vmatprep.subr.bf16.mxu0 %v1450_v4  ;;  %v57_v13 = vld [vmem:[#allocation5 + $0x58] sm:$0xff]  ;;  %986 = vmatprep.subr.bf16.mxu1 %v1450_v4  ;;  %v1459_v14 = vpack.c.bf16 %v52_v11, %v50_v10  ;;  %v54_v16 = vld [vmem:[#allocation5 + $0x40] sm:$0xff] }
  0x2b   :  { %956 = vmatpush1.bf16.msra.mxu0 %v1452_v8  ;;  %988 = vmatpush1.bf16.msra.mxu1 %v1452_v8  ;;  %v1463_v15 = vpack.c.bf16 %v57_v13, %v55_v12  ;;  %v56_v17 = vld [vmem:[#allocation5 + $0x50] sm:$0xff]  ;;  %v59_v18 = vld [vmem:[#allocation5 + $0x68] sm:$0xff]  ;;  %v61_v19 = vld [vmem:[#allocation5 + $0x78] sm:$0xff]  ;;  %v82_v52 = vsub.s32 0, %v81_v51  ;;  %v86_v59 = vsub.s32 1, %v81_v51 }
  0x2c   :  { %958 = vmatprep.subr.bf16.mxu0 %v1454_v9  ;;  %990 = vmatprep.subr.bf16.mxu1 %v1454_v9  ;;  %v1467_v20 = vpack.c.bf16 %v56_v17, %v54_v16  ;;  %v1471_v21 = vpack.c.bf16 %v61_v19, %v59_v18  ;;  %v58_v22 = vld [vmem:[#allocation5 + $0x60] sm:$0xff]  ;;  %v60_v23 = vld [vmem:[#allocation5 + $0x70] sm:$0xff]  ;;  %v63_v24 = vld [vmem:[#allocation5 + $0x88] sm:$0xff] }
  0x2d   :  { %v65_v25 = vld [vmem:[#allocation5 + $0x98] sm:$0xff]  ;;  %v1475_v26 = vpack.c.bf16 %v60_v23, %v58_v22  ;;  %v62_v28 = vld [vmem:[#allocation5 + $0x80] sm:$0xff]  ;;  %v64_v29 = vld [vmem:[#allocation5 + $0x90] sm:$0xff] }
  0x2e   :  { %v1479_v27 = vpack.c.bf16 %v65_v25, %v63_v24  ;;  %v67_v30 = vld [vmem:[#allocation5 + $0xa8] sm:$0xff]  ;;  %v69_v31 = vld [vmem:[#allocation5 + $0xb8] sm:$0xff]  ;;  %v1483_v32 = vpack.c.bf16 %v64_v29, %v62_v28  ;;  %v66_v34 = vld [vmem:[#allocation5 + $0xa0] sm:$0xff] }
  0x2f   :  { %960 = vmatpush1.bf16.msra.mxu0 %v1459_v14  ;;  %992 = vmatpush1.bf16.msra.mxu1 %v1459_v14  ;;  %v1487_v33 = vpack.c.bf16 %v69_v31, %v67_v30  ;;  %v68_v35 = vld [vmem:[#allocation5 + $0xb0] sm:$0xff]  ;;  %v71_v36 = vld [vmem:[#allocation5 + $0xc8] sm:$0xff]  ;;  %v73_v37 = vld [vmem:[#allocation5 + $0xd8] sm:$0xff] }
  0x30   :  { %962 = vmatprep.subr.bf16.mxu0 %v1463_v15  ;;  %994 = vmatprep.subr.bf16.mxu1 %v1463_v15  ;;  %v1491_v38 = vpack.c.bf16 %v68_v35, %v66_v34  ;;  %v1495_v39 = vpack.c.bf16 %v73_v37, %v71_v36  ;;  %v70_v40 = vld [vmem:[#allocation5 + $0xc0] sm:$0xff]  ;;  %v72_v41 = vld [vmem:[#allocation5 + $0xd0] sm:$0xff]  ;;  %v75_v42 = vld [vmem:[#allocation5 + $0xe8] sm:$0xff] }
  0x31   :  { %v77_v43 = vld [vmem:[#allocation5 + $0xf8] sm:$0xff]  ;;  %v1499_v44 = vpack.c.bf16 %v72_v41, %v70_v40  ;;  %v74_v46 = vld [vmem:[#allocation5 + $0xe0] sm:$0xff]  ;;  %v76_v47 = vld [vmem:[#allocation5 + $0xf0] sm:$0xff] }
  0x32   :  { %v1503_v45 = vpack.c.bf16 %v77_v43, %v75_v42  ;;  %v1507_v48 = vpack.c.bf16 %v76_v47, %v74_v46  ;;  %v91_v49 = vld [vmem:[#allocation2] sm:$0xff]  ;;  %v78_v53 = vld [vmem:[%s1719_s3] sm:$0x3]  ;;  %s1396_s3 = smov 64   ;;  %v195_v17 = vld [vmem:[#allocation2 + $0x8] sm:$0xff] }
  0x33   :  { %964 = vmatpush1.bf16.msra.mxu0 %v1467_v20  ;;  %996 = vmatpush1.bf16.msra.mxu1 %v1467_v20  ;;  %v1537_v54 = vrot.slane %v78_v53, %v82_v52  ;;  %v1540_v60 = vrot.slane %v78_v53, %v86_v59 }
  0x34   :  { %966 = vmatprep.subr.bf16.mxu0 %v1471_v21  ;;  %998 = vmatprep.subr.bf16.mxu1 %v1471_v21 }
  0x37   :  { %968 = vmatpush1.bf16.msra.mxu0 %v1475_v26  ;;  %1000 = vmatpush1.bf16.msra.mxu1 %v1475_v26 }
  0x38   :  { %970 = vmatprep.subr.bf16.mxu0 %v1479_v27  ;;  %1002 = vmatprep.subr.bf16.mxu1 %v1479_v27 }
  0x3b   :  { %972 = vmatpush1.bf16.msra.mxu0 %v1483_v32  ;;  %1004 = vmatpush1.bf16.msra.mxu1 %v1483_v32 }
  0x3c   :  { %974 = vmatprep.subr.bf16.mxu0 %v1487_v33  ;;  %1006 = vmatprep.subr.bf16.mxu1 %v1487_v33 }
  0x3f   :  { %976 = vmatpush1.bf16.msra.mxu0 %v1491_v38  ;;  %1008 = vmatpush1.bf16.msra.mxu1 %v1491_v38 }
  0x40   :  { %978 = vmatprep.subr.bf16.mxu0 %v1495_v39  ;;  %1010 = vmatprep.subr.bf16.mxu1 %v1495_v39 }
  0x43   :  { %980 = vmatpush1.bf16.msra.mxu0 %v1499_v44  ;;  %1012 = vmatpush1.bf16.msra.mxu1 %v1499_v44 }
  0x44   :  { %982 = vmatprep.subr.bf16.mxu0 %v1503_v45  ;;  %1014 = vmatprep.subr.bf16.mxu1 %v1503_v45 }
  0x47   :  { %984 = vmatpush1.bf16.msra.mxu0 %v1507_v48  ;;  %1016 = vmatpush1.bf16.msra.mxu1 %v1507_v48 }
  0x48   :  { %1018 = vmatprep.subr.bf16.mxu0 %v1450_v4  ;;  %1050 = vmatprep.subr.bf16.mxu1 %v1450_v4 }
  0x4a   :  { %936 = vmatmul.mubr.msk.f32.vlgmr.msra.gmra.mrb[0].mxu0 %vm92_vm0, %v91_v49  ;;  %v298_v49 = vld [vmem:[#allocation2 + $0x10] sm:$0xff] }
  0x4b   :  { %1020 = vmatpush1.bf16.msra.mxu0 %v1452_v8  ;;  %364 = vmatprep.mubr.f32.mxu0 %v1395_v0 }
  0x4c   :  { %1022 = vmatprep.subr.bf16.mxu0 %v1454_v9 }
  0x4f   :  { %1024 = vmatpush1.bf16.msra.mxu0 %v1459_v14 }
  0x50   :  { %1026 = vmatprep.subr.bf16.mxu0 %v1463_v15 }
  0x53   :  { %1028 = vmatpush1.bf16.msra.mxu0 %v1467_v20 }
  0x54   :  { %1030 = vmatprep.subr.bf16.mxu0 %v1471_v21 }
  0x57   :  { %1032 = vmatpush1.bf16.msra.mxu0 %v1475_v26 }
  0x58   :  { %1034 = vmatprep.subr.bf16.mxu0 %v1479_v27 }
  0x5b   :  { %1036 = vmatpush1.bf16.msra.mxu0 %v1483_v32 }
  0x5c   :  { %1038 = vmatprep.subr.bf16.mxu0 %v1487_v33 }
  0x5f   :  { %1040 = vmatpush1.bf16.msra.mxu0 %v1491_v38 }
  0x60   :  { %1042 = vmatprep.subr.bf16.mxu0 %v1495_v39 }
  0x63   :  { %1044 = vmatpush1.bf16.msra.mxu0 %v1499_v44 }
  0x64   :  { %1046 = vmatprep.subr.bf16.mxu0 %v1503_v45 }
  0x67   :  { %1048 = vmatpush1.bf16.msra.mxu0 %v1507_v48 }
  0x68   :  { %1082 = vmatprep.subr.bf16.mxu0 %v1450_v4 }
 0x11d   :  { %v160_v55 = vpop.f32.mrb[0].mxu0 }
 0x11e   :  { %v161_v56 = vadd.f32 %v160_v55, %v1537_v54  ;;  %v162_v57 = vpop.f32.mrb[1].mxu0 }
 0x11f   :  { %v163_v61 = vadd.f32 %v162_v57, %v1540_v60 }
 0x120   :  { %v937_v58 = vmul.f32 -1.442695, %v161_v56 }
 0x121   :  { %v938_v5 = vmul.f32 -1.442695, %v163_v61 }
 0x122   :  { %1221 = vpow2.f32 %v937_v58 }
 0x123   :  { %1223 = vtanh.f32 %v163_v61 }
 0x12c   :  { %v1222_v62 = vpop.eup %1221 }
 0x12d   :  { %v168_v63 = vadd.f32 1.0, %v1222_v62  ;;  %v1224_v1 = vpop.eup %1223 }
 0x12f   :  { %1225 = vrcp.f32 %v168_v63 }
 0x130   :  { %1227 = vpow2.f32 %v938_v5 }
 0x139   :  { %v1226_v2 = vpop.eup %1225 }
 0x13a   :  { %v179_v3 = vmul.f32 %v1226_v2, %v1224_v1  ;;  %v1228_v6 = vpop.eup %1227  ;;  %v178_v10 = vmul.f32 0.0, %v1226_v2 }
 0x13b   :  { %v175_v7 = vadd.f32 1.0, %v1228_v6 }
 0x13c   :  { %181 = vrot.lane.b32.xlu0 %v179_v3, %s1396_s3 }
 0x13d   :  { %1229 = vrcp.f32 %v175_v7 }
 0x147   :  { %v1230_v13 = vpop.eup %1229 }
 0x1ae   :  { %v182_v11 = vpop.permute.xlu0 %181 }
 0x1af   :  { %v184_v12 = vadd.f32 %v182_v11, %v178_v10 }
 0x1b1   :  { %1231 = vtanh.f32 %v184_v12 }
 0x1bb   :  { %v1232_v16 = vpop.eup %1231 }
 0x1bc   :  { %v1544_v18 = vmul.f32 %v1232_v16, %v1230_v13 }
 0x1be   :  { %v196_v19 = vsel %vm92_vm0, %v195_v17, %v1544_v18 }
 0x1bf   :  { %262 = vmatmul.mubr.f32.vlgmr.msra.gmra.mrb[0].mxu1 %v196_v19 }
 0x1c0   :  { %1052 = vmatpush1.bf16.msra.mxu1 %v1452_v8  ;;  %467 = vmatprep.mubr.f32.mxu1 %v1395_v0 }
 0x1c1   :  { %1054 = vmatprep.subr.bf16.mxu1 %v1454_v9 }
 0x1c4   :  { %1056 = vmatpush1.bf16.msra.mxu1 %v1459_v14 }
 0x1c5   :  { %1058 = vmatprep.subr.bf16.mxu1 %v1463_v15 }
 0x1c8   :  { %1060 = vmatpush1.bf16.msra.mxu1 %v1467_v20 }
 0x1c9   :  { %1062 = vmatprep.subr.bf16.mxu1 %v1471_v21 }
 0x1cc   :  { %1064 = vmatpush1.bf16.msra.mxu1 %v1475_v26 }
 0x1cd   :  { %1066 = vmatprep.subr.bf16.mxu1 %v1479_v27 }
 0x1d0   :  { %1068 = vmatpush1.bf16.msra.mxu1 %v1483_v32 }
 0x1d1   :  { %1070 = vmatprep.subr.bf16.mxu1 %v1487_v33 }
 0x1d4   :  { %1072 = vmatpush1.bf16.msra.mxu1 %v1491_v38 }
 0x1d5   :  { %1074 = vmatprep.subr.bf16.mxu1 %v1495_v39 }
 0x1d8   :  { %1076 = vmatpush1.bf16.msra.mxu1 %v1499_v44 }
 0x1d9   :  { %1078 = vmatprep.subr.bf16.mxu1 %v1503_v45 }
 0x1dc   :  { %1080 = vmatpush1.bf16.msra.mxu1 %v1507_v48 }
 0x1dd   :  { %1114 = vmatprep.subr.bf16.mxu1 %v1450_v4 }
 0x292   :  { %v263_v22 = vpop.f32.mrb[0].mxu1 }
 0x293   :  { %v264_v23 = vadd.f32 %v263_v22, %v1537_v54  ;;  %v265_v24 = vpop.f32.mrb[1].mxu1 }
 0x294   :  { %v266_v28 = vadd.f32 %v265_v24, %v1540_v60 }
 0x295   :  { %v939_v25 = vmul.f32 -1.442695, %v264_v23 }
 0x296   :  { %v940_v36 = vmul.f32 -1.442695, %v266_v28 }
 0x297   :  { %1233 = vpow2.f32 %v939_v25 }
 0x298   :  { %1235 = vtanh.f32 %v266_v28 }
 0x2a1   :  { %v1234_v29 = vpop.eup %1233 }
 0x2a2   :  { %v271_v30 = vadd.f32 1.0, %v1234_v29  ;;  %v1236_v31 = vpop.eup %1235 }
 0x2a4   :  { %1237 = vrcp.f32 %v271_v30 }
 0x2a5   :  { %1239 = vpow2.f32 %v940_v36 }
 0x2ae   :  { %v1238_v34 = vpop.eup %1237 }
 0x2af   :  { %v282_v35 = vmul.f32 %v1238_v34, %v1236_v31  ;;  %v1240_v37 = vpop.eup %1239  ;;  %v281_v41 = vmul.f32 %v1238_v34, %v184_v12  ;;  %v401_v12 = vld [vmem:[#allocation2 + $0x18] sm:$0xff] }
 0x2b0   :  { %v278_v40 = vadd.f32 1.0, %v1240_v37 }
 0x2b1   :  { %284 = vrot.lane.b32.xlu0 %v282_v35, %s1396_s3 }
 0x2b2   :  { %1241 = vrcp.f32 %v278_v40 }
 0x2bc   :  { %v1242_v46 = vpop.eup %1241 }
 0x323   :  { %v285_v42 = vpop.permute.xlu0 %284 }
 0x324   :  { %v287_v43 = vadd.f32 %v285_v42, %v281_v41 }
 0x326   :  { %1243 = vtanh.f32 %v287_v43 }
 0x330   :  { %v1244_v47 = vpop.eup %1243 }
 0x331   :  { %v1568_v50 = vmul.f32 %v1244_v47, %v1242_v46 }
 0x333   :  { %v299_v51 = vsel %vm92_vm0, %v298_v49, %v1568_v50 }
 0x334   :  { %365 = vmatmul.mubr.f32.vlgmr.msra.gmra.mrb[2].mxu0 %v299_v51 }
 0x335   :  { %1084 = vmatpush1.bf16.msra.mxu0 %v1452_v8  ;;  %570 = vmatprep.mubr.f32.mxu0 %v1395_v0 }
 0x336   :  { %1086 = vmatprep.subr.bf16.mxu0 %v1454_v9 }
 0x339   :  { %1088 = vmatpush1.bf16.msra.mxu0 %v1459_v14 }
 0x33a   :  { %1090 = vmatprep.subr.bf16.mxu0 %v1463_v15 }
 0x33d   :  { %1092 = vmatpush1.bf16.msra.mxu0 %v1467_v20 }
 0x33e   :  { %1094 = vmatprep.subr.bf16.mxu0 %v1471_v21 }
 0x341   :  { %1096 = vmatpush1.bf16.msra.mxu0 %v1475_v26 }
 0x342   :  { %1098 = vmatprep.subr.bf16.mxu0 %v1479_v27 }
 0x345   :  { %1100 = vmatpush1.bf16.msra.mxu0 %v1483_v32 }
 0x346   :  { %1102 = vmatprep.subr.bf16.mxu0 %v1487_v33 }
 0x349   :  { %1104 = vmatpush1.bf16.msra.mxu0 %v1491_v38 }
 0x34a   :  { %1106 = vmatprep.subr.bf16.mxu0 %v1495_v39 }
 0x34d   :  { %1108 = vmatpush1.bf16.msra.mxu0 %v1499_v44 }
 0x34e   :  { %1110 = vmatprep.subr.bf16.mxu0 %v1503_v45 }
 0x351   :  { %1112 = vmatpush1.bf16.msra.mxu0 %v1507_v48 }
 0x352   :  { %1146 = vmatprep.subr.bf16.mxu0 %v1450_v4 }
 0x407   :  { %v366_v52 = vpop.f32.mrb[2].mxu0 }
 0x408   :  { %v367_v53 = vadd.f32 %v366_v52, %v1537_v54  ;;  %v368_v55 = vpop.f32.mrb[3].mxu0 }
 0x409   :  { %v369_v57 = vadd.f32 %v368_v55, %v1540_v60 }
 0x40a   :  { %v941_v56 = vmul.f32 -1.442695, %v367_v53 }
 0x40b   :  { %v942_v1 = vmul.f32 -1.442695, %v369_v57 }
 0x40c   :  { %1245 = vpow2.f32 %v941_v56 }
 0x40d   :  { %1247 = vtanh.f32 %v369_v57 }
 0x416   :  { %v1246_v58 = vpop.eup %1245 }
 0x417   :  { %v374_v59 = vadd.f32 1.0, %v1246_v58  ;;  %v1248_v61 = vpop.eup %1247 }
 0x419   :  { %1249 = vrcp.f32 %v374_v59 }
 0x41a   :  { %1251 = vpow2.f32 %v942_v1 }
 0x423   :  { %v1250_v62 = vpop.eup %1249 }
 0x424   :  { %v385_v63 = vmul.f32 %v1250_v62, %v1248_v61  ;;  %v1252_v2 = vpop.eup %1251  ;;  %v384_v5 = vmul.f32 %v1250_v62, %v287_v43  ;;  %v504_v43 = vld [vmem:[#allocation2 + $0x20] sm:$0xff] }
 0x425   :  { %v381_v3 = vadd.f32 1.0, %v1252_v2 }
 0x426   :  { %387 = vrot.lane.b32.xlu1 %v385_v63, %s1396_s3 }
 0x427   :  { %1253 = vrcp.f32 %v381_v3 }
 0x431   :  { %v1254_v10 = vpop.eup %1253 }
 0x498   :  { %v388_v6 = vpop.permute.xlu1 %387 }
 0x499   :  { %v390_v7 = vadd.f32 %v388_v6, %v384_v5 }
 0x49b   :  { %1255 = vtanh.f32 %v390_v7 }
 0x4a5   :  { %v1256_v11 = vpop.eup %1255 }
 0x4a6   :  { %v1592_v13 = vmul.f32 %v1256_v11, %v1254_v10  ;;  %v607_v10 = vld [vmem:[#allocation2 + $0x28] sm:$0xff] }
 0x4a8   :  { %v402_v16 = vsel %vm92_vm0, %v401_v12, %v1592_v13 }
 0x4a9   :  { %468 = vmatmul.mubr.f32.vlgmr.msra.gmra.mrb[2].mxu1 %v402_v16 }
 0x4aa   :  { %1116 = vmatpush1.bf16.msra.mxu1 %v1452_v8  ;;  %673 = vmatprep.mubr.f32.mxu1 %v1395_v0 }
 0x4ab   :  { %1118 = vmatprep.subr.bf16.mxu1 %v1454_v9 }
 0x4ae   :  { %1120 = vmatpush1.bf16.msra.mxu1 %v1459_v14 }
 0x4af   :  { %1122 = vmatprep.subr.bf16.mxu1 %v1463_v15 }
 0x4b2   :  { %1124 = vmatpush1.bf16.msra.mxu1 %v1467_v20 }
 0x4b3   :  { %1126 = vmatprep.subr.bf16.mxu1 %v1471_v21 }
 0x4b6   :  { %1128 = vmatpush1.bf16.msra.mxu1 %v1475_v26 }
 0x4b7   :  { %1130 = vmatprep.subr.bf16.mxu1 %v1479_v27 }
 0x4ba   :  { %1132 = vmatpush1.bf16.msra.mxu1 %v1483_v32 }
 0x4bb   :  { %1134 = vmatprep.subr.bf16.mxu1 %v1487_v33 }
 0x4be   :  { %1136 = vmatpush1.bf16.msra.mxu1 %v1491_v38 }
 0x4bf   :  { %1138 = vmatprep.subr.bf16.mxu1 %v1495_v39 }
 0x4c2   :  { %1140 = vmatpush1.bf16.msra.mxu1 %v1499_v44 }
 0x4c3   :  { %1142 = vmatprep.subr.bf16.mxu1 %v1503_v45 }
 0x4c6   :  { %1144 = vmatpush1.bf16.msra.mxu1 %v1507_v48 }
 0x4c7   :  { %1178 = vmatprep.subr.bf16.mxu1 %v1450_v4 }
 0x57c   :  { %v469_v17 = vpop.f32.mrb[2].mxu1 }
 0x57d   :  { %v470_v19 = vadd.f32 %v469_v17, %v1537_v54  ;;  %v471_v22 = vpop.f32.mrb[3].mxu1 }
 0x57e   :  { %v472_v24 = vadd.f32 %v471_v22, %v1540_v60 }
 0x57f   :  { %v943_v23 = vmul.f32 -1.442695, %v470_v19 }
 0x580   :  { %v944_v34 = vmul.f32 -1.442695, %v472_v24 }
 0x581   :  { %1257 = vpow2.f32 %v943_v23 }
 0x582   :  { %1259 = vtanh.f32 %v472_v24 }
 0x58b   :  { %v1258_v25 = vpop.eup %1257 }
 0x58c   :  { %v477_v28 = vadd.f32 1.0, %v1258_v25  ;;  %v1260_v29 = vpop.eup %1259  ;;  %v710_v25 = vld [vmem:[#allocation2 + $0x30] sm:$0xff] }
 0x58e   :  { %1261 = vrcp.f32 %v477_v28 }
 0x58f   :  { %1263 = vpow2.f32 %v944_v34 }
 0x598   :  { %v1262_v30 = vpop.eup %1261 }
 0x599   :  { %v488_v31 = vmul.f32 %v1262_v30, %v1260_v29  ;;  %v1264_v4 = vpop.eup %1263  ;;  %v487_v36 = vmul.f32 %v1262_v30, %v390_v7 }
 0x59a   :  { %v484_v35 = vadd.f32 1.0, %v1264_v4 }
 0x59b   :  { %490 = vrot.lane.b32.xlu1 %v488_v31, %s1396_s3 }
 0x59c   :  { %1265 = vrcp.f32 %v484_v35 }
 0x5a6   :  { %v1266_v41 = vpop.eup %1265 }
 0x60d   :  { %v491_v37 = vpop.permute.xlu1 %490 }
 0x60e   :  { %v493_v40 = vadd.f32 %v491_v37, %v487_v36 }
 0x610   :  { %1267 = vtanh.f32 %v493_v40 }
 0x61a   :  { %v1268_v42 = vpop.eup %1267 }
 0x61b   :  { %v1616_v46 = vmul.f32 %v1268_v42, %v1266_v41 }
 0x61d   :  { %v505_v47 = vsel %vm92_vm0, %v504_v43, %v1616_v46 }
 0x61e   :  { %571 = vmatmul.mubr.f32.vlgmr.msra.gmra.mrb[4].mxu0 %v505_v47 }
 0x61f   :  { %1148 = vmatpush1.bf16.msra.mxu0 %v1452_v8  ;;  %776 = vmatprep.mubr.f32.mxu0 %v1395_v0 }
 0x620   :  { %1150 = vmatprep.subr.bf16.mxu0 %v1454_v9 }
 0x623   :  { %1152 = vmatpush1.bf16.msra.mxu0 %v1459_v14 }
 0x624   :  { %1154 = vmatprep.subr.bf16.mxu0 %v1463_v15 }
 0x627   :  { %1156 = vmatpush1.bf16.msra.mxu0 %v1467_v20 }
 0x628   :  { %1158 = vmatprep.subr.bf16.mxu0 %v1471_v21 }
 0x62b   :  { %1160 = vmatpush1.bf16.msra.mxu0 %v1475_v26 }
 0x62c   :  { %1162 = vmatprep.subr.bf16.mxu0 %v1479_v27 }
 0x62f   :  { %1164 = vmatpush1.bf16.msra.mxu0 %v1483_v32 }
 0x630   :  { %1166 = vmatprep.subr.bf16.mxu0 %v1487_v33 }
 0x633   :  { %1168 = vmatpush1.bf16.msra.mxu0 %v1491_v38 }
 0x634   :  { %1170 = vmatprep.subr.bf16.mxu0 %v1495_v39 }
 0x637   :  { %1172 = vmatpush1.bf16.msra.mxu0 %v1499_v44 }
 0x638   :  { %1174 = vmatprep.subr.bf16.mxu0 %v1503_v45 }
 0x63b   :  { %1176 = vmatpush1.bf16.msra.mxu0 %v1507_v48 }
 0x6f1   :  { %v572_v49 = vpop.f32.mrb[4].mxu0 }
 0x6f2   :  { %v573_v51 = vadd.f32 %v572_v49, %v1537_v54  ;;  %v574_v52 = vpop.f32.mrb[5].mxu0 }
 0x6f3   :  { %v575_v55 = vadd.f32 %v574_v52, %v1540_v60 }
 0x6f4   :  { %v945_v53 = vmul.f32 -1.442695, %v573_v51 }
 0x6f5   :  { %v946_v62 = vmul.f32 -1.442695, %v575_v55 }
 0x6f6   :  { %1269 = vpow2.f32 %v945_v53 }
 0x6f7   :  { %1271 = vtanh.f32 %v575_v55 }
 0x700   :  { %v1270_v56 = vpop.eup %1269 }
 0x701   :  { %v580_v57 = vadd.f32 1.0, %v1270_v56  ;;  %v1272_v58 = vpop.eup %1271 }
 0x703   :  { %1273 = vrcp.f32 %v580_v57 }
 0x704   :  { %1275 = vpow2.f32 %v946_v62 }
 0x70d   :  { %v1274_v59 = vpop.eup %1273 }
 0x70e   :  { %v591_v61 = vmul.f32 %v1274_v59, %v1272_v58  ;;  %v1276_v63 = vpop.eup %1275  ;;  %v590_v2 = vmul.f32 %v1274_v59, %v493_v40 }
 0x70f   :  { %v587_v1 = vadd.f32 1.0, %v1276_v63 }
 0x710   :  { %593 = vrot.lane.b32.xlu0 %v591_v61, %s1396_s3  ;;  %v813_v61 = vld [vmem:[#allocation2 + $0x38] sm:$0xff] }
 0x711   :  { %1277 = vrcp.f32 %v587_v1 }
 0x71b   :  { %v1278_v6 = vpop.eup %1277 }
 0x782   :  { %v594_v3 = vpop.permute.xlu0 %593 }
 0x783   :  { %v596_v5 = vadd.f32 %v594_v3, %v590_v2 }
 0x785   :  { %1279 = vtanh.f32 %v596_v5 }
 0x78f   :  { %v1280_v7 = vpop.eup %1279 }
 0x790   :  { %v1639_v11 = vmul.f32 %v1280_v7, %v1278_v6 }
 0x792   :  { %v608_v12 = vsel %vm92_vm0, %v607_v10, %v1639_v11 }
 0x793   :  { %674 = vmatmul.mubr.f32.vlgmr.msra.gmra.mrb[4].mxu1 %v608_v12 }
 0x794   :  { %1180 = vmatpush1.bf16.msra.mxu1 %v1452_v8  ;;  %879 = vmatprep.mubr.f32.mxu1 %v1395_v0  ;;  %v1397_v0 = vmov 0  }
 0x795   :  { %1182 = vmatprep.subr.bf16.mxu1 %v1454_v9  ;;  %1219 = vset.pattern.permute.xlu1 %v1397_v0 }
 0x796   :  { %1220 = vset.pattern.permute.xlu0 %v1397_v0 }
 0x798   :  { %1184 = vmatpush1.bf16.msra.mxu1 %v1459_v14 }
 0x799   :  { %1186 = vmatprep.subr.bf16.mxu1 %v1463_v15 }
 0x79c   :  { %1188 = vmatpush1.bf16.msra.mxu1 %v1467_v20 }
 0x79d   :  { %1190 = vmatprep.subr.bf16.mxu1 %v1471_v21 }
 0x7a0   :  { %1192 = vmatpush1.bf16.msra.mxu1 %v1475_v26 }
 0x7a1   :  { %1194 = vmatprep.subr.bf16.mxu1 %v1479_v27  ;;  %v1666_v27 = vld [vmem:[%s1716_s0] sm:$0xff]  ;;  %s1398_s0 = smov [#allocation7]  }
 0x7a2   :  { %vm187_vm1 = vcmp.eq.s32.totalorder %v1666_v27, 0  ;;  %vm290_vm2 = vcmp.eq.s32.totalorder %v1666_v27, 1  ;;  %vm496_vm3 = vcmp.eq.s32.totalorder %v1666_v27, 3  ;;  %vm599_vm4 = vcmp.eq.s32.totalorder %v1666_v27, 4  ;;  %s926_s19 = sshll.u32 %s1398_s0, 4  ;;  %s927_s19 = int_to_ptr.vmem [resolvable:$true] %s926_s19 }
 0x7a3   :  { %v497_v30 = vsel %vm496_vm3, 1, %v1397_v0  ;;  %v600_v31 = vsel %vm599_vm4, 1, %v1397_v0  ;;  %vm393_vm5 = vcmp.eq.s32.totalorder %v1666_v27, 2  ;;  %vm805_vm6 = vcmp.eq.s32.totalorder %v1666_v27, 6  ;;  %s1361_s20 = scalar_lea.vmem %s927_s19, 128  ;;  %p1366_p3 = scmp.lt.s32.totalorder %s927_s19, %s927_s19 }
 0x7a4   :  { %1196 = vmatpush1.bf16.msra.mxu1 %v1483_v32  ;;  %v394_v49 = vsel %vm393_vm5, 1, %v1397_v0  ;;  %v806_v1 = vsel %vm805_vm6, 1, %v1397_v0  ;;  %vm702_vm7 = vcmp.eq.s32.totalorder %v1666_v27, 5  ;;  %vm908_vm8 = vcmp.eq.s32.totalorder %v1666_v27, 7  ;;  %p1362_p2 = scmp.ne.s32.totalorder %s927_s19, %s1361_s20  ;;  %p1367_p4 = scmp.lt.s32.totalorder %s1361_s20, %s1361_s20 }
 0x7a5   :  { %1198 = vmatprep.subr.bf16.mxu1 %v1487_v33 }
 0x7a6   :  { %p1368_p5 = por %p1367_p4, %p1366_p3 }
 0x7a8   :  { %1200 = vmatpush1.bf16.msra.mxu1 %v1491_v38  ;;  %p1369_p6 = pnand %p1368_p5, %p1362_p2 }
 0x7a9   :  { %1202 = vmatprep.subr.bf16.mxu1 %v1495_v39  ;;  %v188_v39 = vsel %vm187_vm1, 1, %v1397_v0 }
 0x7ac   :  { %1204 = vmatpush1.bf16.msra.mxu1 %v1499_v44  ;;  %v291_v44 = vsel %vm290_vm2, 1, %v1397_v0 }
 0x7ad   :  { %1206 = vmatprep.subr.bf16.mxu1 %v1503_v45 }
 0x7b0   :  { %1208 = vmatpush1.bf16.msra.mxu1 %v1507_v48 }
 0x866   :  { %v675_v8 = vpop.f32.mrb[4].mxu1 }
 0x867   :  { %v676_v9 = vadd.f32 %v675_v8, %v1537_v54  ;;  %v677_v14 = vpop.f32.mrb[5].mxu1 }
 0x868   :  { %v678_v20 = vadd.f32 %v677_v14, %v1540_v60 }
 0x869   :  { %v947_v15 = vmul.f32 -1.442695, %v676_v9 }
 0x86a   :  { %v948_v45 = vmul.f32 -1.442695, %v678_v20 }
 0x86b   :  { %1281 = vpow2.f32 %v947_v15  ;;  %v703_v15 = vsel %vm702_vm7, 1, %v1397_v0 }
 0x86c   :  { %1283 = vtanh.f32 %v678_v20 }
 0x875   :  { %v1282_v21 = vpop.eup %1281 }
 0x876   :  { %v683_v26 = vadd.f32 1.0, %v1282_v21  ;;  %v1284_v32 = vpop.eup %1283 }
 0x878   :  { %1285 = vrcp.f32 %v683_v26 }
 0x879   :  { %1287 = vpow2.f32 %v948_v45 }
 0x882   :  { %v1286_v33 = vpop.eup %1285 }
 0x883   :  { %v694_v38 = vmul.f32 %v1286_v33, %v1284_v32  ;;  %v1288_v48 = vpop.eup %1287  ;;  %v693_v17 = vmul.f32 %v1286_v33, %v596_v5 }
 0x884   :  { %v690_v16 = vadd.f32 1.0, %v1288_v48 }
 0x885   :  { %696 = vrot.lane.b32.xlu1 %v694_v38, %s1396_s3 }
 0x886   :  { %1289 = vrcp.f32 %v690_v16 }
 0x889   :  { %190 = vperm.xlu1 %1219, %v188_v39  }
 0x88d   :  { %293 = vperm.xlu1 %1219, %v291_v44  }
 0x890   :  { %v1290_v23 = vpop.eup %1289 }
 0x891   :  { %499 = vperm.xlu1 %1219, %v497_v30  }
 0x895   :  { %602 = vperm.xlu1 %1219, %v600_v31  }
 0x899   :  { %808 = vperm.xlu1 %1219, %v806_v1  }
 0x8f7   :  { %v697_v19 = vpop.permute.xlu1 %696 }
 0x8f8   :  { %v699_v22 = vadd.f32 %v697_v19, %v693_v17 }
 0x8fa   :  { %1291 = vtanh.f32 %v699_v22 }
 0x904   :  { %v1292_v24 = vpop.eup %1291 }
 0x905   :  { %v1673_v28 = vmul.f32 %v1292_v24, %v1290_v23 }
 0x907   :  { %v711_v29 = vsel %vm92_vm0, %v710_v25, %v1673_v28 }
 0x908   :  { %777 = vmatmul.mubr.f32.vlgmr.msra.gmra.mrb[6].mxu0 %v711_v29  ;;  %v191_v21 = vpop.permute.xlu1 %190 }
 0x909   :  { %vm192_vm9 = vcmp.eq.s32.totalorder %v191_v21, 1 }
 0x90a   :  { %v193_v27 = vsel %vm192_vm9, %v1544_v18, 0.0 }
 0x90c   :  { %v294_v44 = vpop.permute.xlu1 %293 }
 0x90d   :  { %vm295_vm10 = vcmp.eq.s32.totalorder %v294_v44, 1 }
 0x910   :  { %v500_v45 = vpop.permute.xlu1 %499 }
 0x911   :  { %vm501_vm12 = vcmp.eq.s32.totalorder %v500_v45, 1 }
 0x914   :  { %v603_v17 = vpop.permute.xlu1 %602 }
 0x915   :  { %vm604_vm13 = vcmp.eq.s32.totalorder %v603_v17, 1 }
 0x918   :  { %v809_v29 = vpop.permute.xlu1 %808 }
 0x919   :  { %vm810_vm15 = vcmp.eq.s32.totalorder %v809_v29, 1 }
 0x9db   :  { %v778_v34 = vpop.f32.mrb[6].mxu0 }
 0x9dc   :  { %v779_v4 = vadd.f32 %v778_v34, %v1537_v54  ;;  %v780_v35 = vpop.f32.mrb[7].mxu0 }
 0x9dd   :  { %v781_v37 = vadd.f32 %v780_v35, %v1540_v60 }
 0x9de   :  { %v949_v36 = vmul.f32 -1.442695, %v779_v4 }
 0x9df   :  { %v950_v51 = vmul.f32 -1.442695, %v781_v37 }
 0x9e0   :  { %1293 = vpow2.f32 %v949_v36 }
 0x9e1   :  { %1295 = vtanh.f32 %v781_v37 }
 0x9ea   :  { %v1294_v40 = vpop.eup %1293 }
 0x9eb   :  { %v786_v41 = vadd.f32 1.0, %v1294_v40  ;;  %v1296_v42 = vpop.eup %1295 }
 0x9ed   :  { %1297 = vrcp.f32 %v786_v41 }
 0x9ee   :  { %1299 = vpow2.f32 %v950_v51 }
 0x9f7   :  { %v1298_v43 = vpop.eup %1297 }
 0x9f8   :  { %v797_v47 = vmul.f32 %v1298_v43, %v1296_v42  ;;  %v1300_v52 = vpop.eup %1299  ;;  %v796_v55 = vmul.f32 %v1298_v43, %v699_v22 }
 0x9f9   :  { %v793_v53 = vadd.f32 1.0, %v1300_v52 }
 0x9fa   :  { %799 = vrot.lane.b32.xlu0 %v797_v47, %s1396_s3 }
 0x9fb   :  { %1301 = vrcp.f32 %v793_v53 }
 0x9fe   :  { %396 = vperm.xlu0 %1220, %v394_v49  }
 0xa05   :  { %v1302_v58 = vpop.eup %1301 }
 0xa6c   :  { %v800_v56 = vpop.permute.xlu0 %799 }
 0xa6d   :  { %v802_v57 = vadd.f32 %v800_v56, %v796_v55 }
 0xa6f   :  { %1303 = vtanh.f32 %v802_v57 }
 0xa79   :  { %v1304_v59 = vpop.eup %1303 }
 0xa7a   :  { %v804_v62 = vmul.f32 %v1304_v59, %v1302_v58 }
 0xa7c   :  { %v814_v63 = vsel %vm92_vm0, %v813_v61, %v804_v62 }
 0xa7d   :  { %880 = vmatmul.mubr.f32.vlgmr.msra.gmra.mrb[6].mxu1 %v814_v63  ;;  %v397_v26 = vpop.permute.xlu0 %396 }
 0xa7e   :  { %vm398_vm11 = vcmp.eq.s32.totalorder %v397_v26, 1 }
 0xb50   :  { %v881_v2 = vpop.f32.mrb[6].mxu1 }
 0xb51   :  { %v882_v3 = vadd.f32 %v881_v2, %v1537_v54  ;;  %v883_v5 = vpop.f32.mrb[7].mxu1  ;;  %v909_v54 = vsel %vm908_vm8, 1, %v1397_v0  ;;  %v296_v0 = vsel %vm295_vm10, %v1568_v50, %v193_v27 }
 0xb52   :  { %v884_v7 = vadd.f32 %v883_v5, %v1540_v60  ;;  %v399_v16 = vsel %vm398_vm11, %v1592_v13, %v296_v0 }
 0xb53   :  { %v951_v6 = vmul.f32 -1.442695, %v882_v3  ;;  %v502_v23 = vsel %vm501_vm12, %v1616_v46, %v399_v16 }
 0xb54   :  { %v952_v60 = vmul.f32 -1.442695, %v884_v7  ;;  %v605_v25 = vsel %vm604_vm13, %v1639_v11, %v502_v23 }
 0xb55   :  { %1305 = vpow2.f32 %v951_v6 }
 0xb56   :  { %1307 = vtanh.f32 %v884_v7 }
 0xb5f   :  { %v1306_v10 = vpop.eup %1305 }
 0xb60   :  { %v889_v12 = vadd.f32 1.0, %v1306_v10  ;;  %v1308_v8 = vpop.eup %1307 }
 0xb62   :  { %1309 = vrcp.f32 %v889_v12 }
 0xb63   :  { %1311 = vpow2.f32 %v952_v60 }
 0xb6c   :  { %v1310_v9 = vpop.eup %1309 }
 0xb6d   :  { %v900_v14 = vmul.f32 %v1310_v9, %v1308_v8  ;;  %v1312_v20 = vpop.eup %1311  ;;  %v899_v33 = vmul.f32 %v1310_v9, %v802_v57 }
 0xb6e   :  { %v896_v32 = vadd.f32 1.0, %v1312_v20 }
 0xb6f   :  { %902 = vrot.lane.b32.xlu0 %v900_v14, %s1396_s3 }
 0xb70   :  { %1313 = vrcp.f32 %v896_v32 }
 0xb73   :  { %705 = vperm.xlu0 %1220, %v703_v15  }
 0xb77   :  { %911 = vperm.xlu0 %1220, %v909_v54  }
 0xb7a   :  { %v1314_v48 = vpop.eup %1313 }
 0xbe1   :  { %v903_v38 = vpop.permute.xlu0 %902 }
 0xbe2   :  { %v905_v39 = vadd.f32 %v903_v38, %v899_v33 }
 0xbe4   :  { %1315 = vtanh.f32 %v905_v39 }
 0xbee   :  { %v1316_v19 = vpop.eup %1315 }
 0xbef   :  { %v907_v22 = vmul.f32 %v1316_v19, %v1314_v48 }
 0xbf2   :  { %v706_v24 = vpop.permute.xlu0 %705 }
 0xbf3   :  { %vm707_vm14 = vcmp.eq.s32.totalorder %v706_v24, 1 }
 0xbf4   :  { %v708_v30 = vsel %vm707_vm14, %v1673_v28, %v605_v25 }
 0xbf5   :  { %v811_v50 = vsel %vm810_vm15, %v804_v62, %v708_v30 }
 0xbf6   :  { %v912_v18 = vpop.permute.xlu0 %911 }
 0xbf7   :  { %vm913_vm1 = vcmp.eq.s32.totalorder %v912_v18, 1 }
 0xbf8   :  { %v914_v31 = vsel %vm913_vm1, %v907_v22, %v811_v50 }
 0xbf9   :  { %916 = vrot.lane.b32.xlu1 %v914_v31, %s1396_s3 }
 0xc6b   :  { %v917_v13 = vpop.permute.xlu1 %916 }
 0xc6c   :  { %919 = vst.msk [vmem:[#allocation7] sm:$0xff] %vm92_vm0, %v917_v13 }
 0xc6d   :  { %1372 = shalt.err (!%p1369_p6)
}
 0xc6e   :  { %s1373_s23 = scalar_lea.hbm %s1720_s4, 128 }
 0xc6f   :  { %p1374_p7 = scmp.ne.s32.totalorder %s1720_s4, %s1373_s23  ;;  %p1377_p8 = scmp.lt.u32.totalorder %s1373_s23, %s1720_s4 }
 0xc71   :  { %p1379_p9 = pnand %p1377_p8, %p1374_p7 }
 0xc73   :  { %1382 = shalt.err (!%p1379_p9)
}
 0xc74   :  { %929 = dma.vmem_to_hbm [thread:$0]  %s927_s19, 128, %s1720_s4, [#allocation4]  }
 0xc75   :  { %1387 = dma.done.wait [#allocation4], 128  }
 0xc76   :  { %1388 = vsyncadd [#allocation4], 4294967168 }
 0xc77   :  { %933 = vsyncpa [#allocation3], 1 }
 0xc78   :  { %934 = vsyncpa [#allocation6], 1 }
 0xc79   :  { %935 = vsyncpa [#allocation4], 1 }

</bundles_post_ra>
